<compile_context>
chip_gen: v7x
topology: tpu7x:2x2x1
jax: 0.10.0
libtpu: 0.0.40
codegen_flags: <defaults>
</compile_context>

<pallas_src>
import jax
import jax.numpy as jnp
from jax import lax
from jax.experimental import pallas as pl
from jax.experimental.pallas import tpu as pltpu


# ---------------------------------------------------------------------------
# Batched matmul + bias:  out = a @ w + b   (M-tiled, weights resident)
# ---------------------------------------------------------------------------
def _matmul_bias_kernel(a_ref, w_ref, b_ref, o_ref):
    acc = jnp.dot(a_ref[...], w_ref[...], preferred_element_type=jnp.float32)
    o_ref[...] = (acc + b_ref[...]).astype(o_ref.dtype)


def _matmul_bias(a, w, b, *, out_dtype=jnp.float32, tm=256):
    """a: (M, K), w: (K, N), b: (1, N) -> (M, N) in out_dtype (f32 accumulate)."""
    M, K = a.shape
    _, N = w.shape
    tm = min(tm, M)
    return pl.pallas_call(
        _matmul_bias_kernel,
        out_shape=jax.ShapeDtypeStruct((M, N), out_dtype),
        grid_spec=pltpu.PrefetchScalarGridSpec(
            num_scalar_prefetch=0,
            grid=(pl.cdiv(M, tm),),
            in_specs=[
                pl.BlockSpec((tm, K), lambda i: (i, 0)),   # activations tile
                pl.BlockSpec((K, N), lambda i: (0, 0)),    # full weight
                pl.BlockSpec((1, N), lambda i: (0, 0)),    # bias row
            ],
            out_specs=pl.BlockSpec((tm, N), lambda i: (i, 0)),
        ),
        compiler_params=pltpu.CompilerParams(
            dimension_semantics=("parallel",)),
    )(a, w, b)


# ---------------------------------------------------------------------------
# LSTM recurrence kernel: TU timesteps per grid step, h/c resident in VMEM.
# ---------------------------------------------------------------------------
def _lstm_recurrence_kernel(gx_ref, h0_ref, c0_ref, whh_ref,
                            hseq_ref, hT_ref, cT_ref,
                            h_s, c_s):
    t_blk = pl.program_id(0)
    H = h_s.shape[-1]
    TU = gx_ref.shape[0]

    # Load initial state into the resident scratch on the first grid step only.
    @pl.when(t_blk == 0)
    def _():
        h_s[...] = h0_ref[0].astype(jnp.float32)
        c_s[...] = c0_ref[0].astype(jnp.float32)

    whh = whh_ref[...]   # (H, 4H), hoisted load (single copy across the loop)

    def step(tt, carry):
        h = h_s[...]                      # (B, H) f32
        c = c_s[...]                      # (B, H) f32
        # x @ W_ih + biases was precomputed outside the recurrence; only the
        # recurrent matmul stays on the serial path.
        gates = gx_ref[tt] + jnp.dot(
            h.astype(whh.dtype), whh, preferred_element_type=jnp.float32)

        # PyTorch gate order [i, f, g, o].  (Lane-aligned views when H % 128 == 0.)
        i_g = jax.nn.sigmoid(gates[:, 0 * H:1 * H])
        f_g = jax.nn.sigmoid(gates[:, 1 * H:2 * H])
        g_g = jnp.tanh(gates[:, 2 * H:3 * H])
        o_g = jax.nn.sigmoid(gates[:, 3 * H:4 * H])

        c_new = f_g * c + i_g * g_g
        h_new = o_g * jnp.tanh(c_new)

        h_s[...] = h_new
        c_s[...] = c_new
        hseq_ref[tt] = h_new.astype(hseq_ref.dtype)
        return carry

    # Unrolled so the LLO scheduler can overlap MXU/VPU/EUP work across steps.
    lax.fori_loop(0, TU, step, 0, unroll=True)

    # Final hidden/cell state: write only once, on the last grid step.
    @pl.when(t_blk == pl.num_programs(0) - 1)
    def _():
        hT_ref[0] = h_s[...].astype(hT_ref.dtype)
        cT_ref[0] = c_s[...].astype(cT_ref.dtype)


def _pick_time_block(T, cap=16):
    """Largest divisor of T that is <= cap (timesteps processed per grid step)."""
    for d in range(min(T, cap), 0, -1):
        if T % d == 0:
            return d
    return 1


# ---------------------------------------------------------------------------
# Decoder forward: LSTM(num_layers=1) + Linear
# ---------------------------------------------------------------------------
def decoder_forward(x, h0, c0, w_ih, w_hh, b_ih, b_hh, w_fc, b_fc,
                    *, matmul_dtype=jnp.float32):
    """Pallas implementation of Decoder.forward (num_layers=1).

    x     : (T, B, I)
    h0,c0 : (1, B, H)
    w_ih  : (4H, I)   w_hh : (4H, H)   b_ih, b_hh : (4H,)   (PyTorch layout)
    w_fc  : (V, H)    b_fc : (V,)
    """
    T, B, I = x.shape
    H = h0.shape[-1]
    V = w_fc.shape[0]

    # Pre-transpose weights so kernels do plain row-major `a @ W`.
    wih_t = jnp.asarray(w_ih.T, matmul_dtype)                  # (I, 4H)
    whh_t = jnp.asarray(w_hh.T, matmul_dtype)                  # (H, 4H)
    b_all = jnp.asarray((b_ih + b_hh)[None, :], jnp.float32)   # (1, 4H)
    wfc_t = jnp.asarray(w_fc.T, matmul_dtype)                  # (H, V)
    bfc_r = jnp.asarray(b_fc[None, :], jnp.float32)            # (1, V)

    # (1) Input projection for ALL timesteps as one MXU-efficient matmul.
    gates_x = _matmul_bias(
        x.reshape(T * B, I).astype(matmul_dtype), wih_t, b_all,
        out_dtype=jnp.float32).reshape(T, B, 4 * H)

    # (2) Serial recurrence, TU timesteps per grid iteration.
    TU = _pick_time_block(T)
    hseq, hT, cT = pl.pallas_call(
        _lstm_recurrence_kernel,
        out_shape=(
            jax.ShapeDtypeStruct((T, B, H), jnp.float32),
            jax.ShapeDtypeStruct((1, B, H), jnp.float32),
            jax.ShapeDtypeStruct((1, B, H), jnp.float32),
        ),
        grid_spec=pltpu.PrefetchScalarGridSpec(
            num_scalar_prefetch=0,
            grid=(T // TU,),
            in_specs=[
                pl.BlockSpec((TU, B, 4 * H), lambda t: (t, 0, 0)),   # gates_x
                pl.BlockSpec((1, B, H), lambda t: (0, 0, 0)),        # h0
                pl.BlockSpec((1, B, H), lambda t: (0, 0, 0)),        # c0
                pl.BlockSpec((H, 4 * H), lambda t: (0, 0)),          # W_hh^T
            ],
            out_specs=[
                pl.BlockSpec((TU, B, H), lambda t: (t, 0, 0)),       # h_t stream
                pl.BlockSpec((1, B, H), lambda t: (0, 0, 0)),        # hT
                pl.BlockSpec((1, B, H), lambda t: (0, 0, 0)),        # cT
            ],
            scratch_shapes=[
                pltpu.VMEM((B, H), jnp.float32),   # resident h state
                pltpu.VMEM((B, H), jnp.float32),   # resident c state
            ],
        ),
        compiler_params=pltpu.CompilerParams(
            dimension_semantics=("arbitrary",)),   # time recurrence is sequential
    )(gates_x, h0, c0, whh_t)
    # TODO(synk): on v7x, add a leading "parallel" batch-tile grid axis to use
    # both TensorCores when B is non-trivial.

    # (3) Output projection for ALL timesteps as one MXU-efficient matmul.
    logits = _matmul_bias(
        hseq.reshape(T * B, H).astype(matmul_dtype), wfc_t, bfc_r,
        out_dtype=jnp.float32).reshape(T, B, V)

    return logits, (hT, cT)


# ---------------------------------------------------------------------------
# Pure-JAX reference, identical to PyTorch nn.LSTM(num_layers=1) + nn.Linear
# ---------------------------------------------------------------------------
def decoder_forward_ref(x, h0, c0, w_ih, w_hh, b_ih, b_hh, w_fc, b_fc):
    H = h0.shape[-1]

    def step(carry, xt):
        h, c = carry
        gates = xt @ w_ih.T + h @ w_hh.T + b_ih + b_hh
        i = jax.nn.sigmoid(gates[:, 0 * H:1 * H])
        f = jax.nn.sigmoid(gates[:, 1 * H:2 * H])
        g = jnp.tanh(gates[:, 2 * H:3 * H])
        o = jax.nn.sigmoid(gates[:, 3 * H:4 * H])
        c_new = f * c + i * g
        h_new = o * jnp.tanh(c_new)
        return (h_new, c_new), h_new

    (hT, cT), hs = lax.scan(step, (h0[0], c0[0]), x)
    out = hs @ w_fc.T + b_fc
    return out, (hT[None], cT[None])


if __name__ == "__main__":
    # Small deterministic problem: T=8, B=2, input_size=16, hidden=32, vocab=64
    T, B, I, H, V = 8, 2, 16, 32, 64
    key = jax.random.PRNGKey(0)
    ks = jax.random.split(key, 9)

    x = jax.random.normal(ks[0], (T, B, I), jnp.float32)
    h0 = jax.random.normal(ks[1], (1, B, H), jnp.float32)
    c0 = jax.random.normal(ks[2], (1, B, H), jnp.float32)

    scale = 1.0 / jnp.sqrt(H)
    w_ih = jax.random.uniform(ks[3], (4 * H, I), jnp.float32, -scale, scale)
    w_hh = jax.random.uniform(ks[4], (4 * H, H), jnp.float32, -scale, scale)
    b_ih = jax.random.uniform(ks[5], (4 * H,), jnp.float32, -scale, scale)
    b_hh = jax.random.uniform(ks[6], (4 * H,), jnp.float32, -scale, scale)
    w_fc = jax.random.uniform(ks[7], (V, H), jnp.float32, -scale, scale)
    b_fc = jax.random.uniform(ks[8], (V,), jnp.float32, -scale, scale)

    out, (hT, cT) = decoder_forward(x, h0, c0, w_ih, w_hh, b_ih, b_hh, w_fc, b_fc)
    jax.block_until_ready((out, hT, cT))

    out_r, (hT_r, cT_r) = decoder_forward_ref(
        x, h0, c0, w_ih, w_hh, b_ih, b_hh, w_fc, b_fc)

    assert out.shape == (T, B, V) and hT.shape == (1, B, H) and cT.shape == (1, B, H)
    assert jnp.allclose(out, out_r, atol=1e-5, rtol=1e-5)
    assert jnp.allclose(hT, hT_r, atol=1e-5, rtol=1e-5)
    assert jnp.allclose(cT, cT_r, atol=1e-5, rtol=1e-5)

    print("KERNEL_OK")
</pallas_src>

<mosaic_0001>
module attributes {stable_mosaic.version = 11 : i64} {
  func.func @_matmul_bias_kernel(%arg0: i32, %arg1: memref<16x16xf32, #tpu.memory_space<vmem>>, %arg2: memref<16x128xf32, #tpu.memory_space<vmem>>, %arg3: memref<1x128xf32, #tpu.memory_space<vmem>>, %arg4: memref<16x128xf32, #tpu.memory_space<vmem>>) attributes {dimension_semantics = [#tpu.dimension_semantics<parallel>], iteration_bounds = array<i64: 1>, scalar_prefetch = 0 : i64, scratch_operands = 0 : i64, tpu.core_type = #tpu.core_type<tc>, window_params = [{transform_indices = @transform_0, window_bounds = array<i64: 16, 16>}, {pipeline_mode = #tpu.pipeline_mode<synchronous>, transform_indices = @transform_1, window_bounds = array<i64: 16, 128>}, {pipeline_mode = #tpu.pipeline_mode<synchronous>, transform_indices = @transform_2, window_bounds = array<i64: 1, 128>}, {transform_indices = @transform_3, window_bounds = array<i64: 16, 128>}]} {
    %c0 = arith.constant 0 : index
    %c0_0 = arith.constant 0 : index
    %0 = vector.load %arg1[%c0, %c0_0] : memref<16x16xf32, #tpu.memory_space<vmem>>, vector<16x16xf32>
    %c0_1 = arith.constant 0 : index
    %c0_2 = arith.constant 0 : index
    %1 = vector.load %arg2[%c0_1, %c0_2] : memref<16x128xf32, #tpu.memory_space<vmem>>, vector<16x128xf32>
    %cst = arith.constant dense<0.000000e+00> : vector<16x128xf32>
    %2 = tpu.matmul %0, %1, %cst {dimension_numbers = #tpu.dot_dimension_numbers<[1], [0], [0], [1], [0, 0, 1, 1], [], []>} : vector<16x16xf32>, vector<16x128xf32>, vector<16x128xf32> -> vector<16x128xf32>
    %c0_3 = arith.constant 0 : index
    %c0_4 = arith.constant 0 : index
    %3 = vector.load %arg3[%c0_3, %c0_4] : memref<1x128xf32, #tpu.memory_space<vmem>>, vector<1x128xf32>
    %4 = vector.broadcast %3 : vector<1x128xf32> to vector<16x128xf32>
    %5 = arith.addf %2, %4 : vector<16x128xf32>
    %c0_5 = arith.constant 0 : index
    %c0_6 = arith.constant 0 : index
    %6 = vector.load %arg4[%c0_5, %c0_6] : memref<16x128xf32, #tpu.memory_space<vmem>>, vector<16x128xf32>
    tpu.vector_store %arg4[%c0_5, %c0_6], %5 {strides = array<i32>} : memref<16x128xf32, #tpu.memory_space<vmem>>, vector<16x128xf32>,
    return
  }
  func.func @transform_0(%arg0: i32) -> (i32, i32) {
    %c0_i32 = arith.constant 0 : i32
    %c0_i32_0 = arith.constant 0 : i32
    return %arg0, %c0_i32 : i32, i32
  }
  func.func @transform_1(%arg0: i32) -> (i32, i32) {
    %c0_i32 = arith.constant 0 : i32
    %c0_i32_0 = arith.constant 0 : i32
    %c0_i32_1 = arith.constant 0 : i32
    return %c0_i32, %c0_i32_0 : i32, i32
  }
  func.func @transform_2(%arg0: i32) -> (i32, i32) {
    %c0_i32 = arith.constant 0 : i32
    %c0_i32_0 = arith.constant 0 : i32
    %c0_i32_1 = arith.constant 0 : i32
    return %c0_i32, %c0_i32_0 : i32, i32
  }
  func.func @transform_3(%arg0: i32) -> (i32, i32) {
    %c0_i32 = arith.constant 0 : i32
    %c0_i32_0 = arith.constant 0 : i32
    return %arg0, %c0_i32 : i32, i32
  }
}

</mosaic_0001>

<bundles_post_ra>
// kernel: tpu_custom_call.1
= control target key start
LH: loop header
LB: loop body
LE: loop exit
PB: predicated region body
PF: predicated region fallthrough
CT: control target
= control target key end

     0   :  { %8 = vsyncpa [#allocation3], 0  ;;  %s324_s0 = inlined_call_operand.hbm [shape: f32[16,16], index: 0, kind: input, shape index: {}]   ;;  %s325_s1 = inlined_call_operand.hbm [shape: f32[16,128], index: 1, kind: input, shape index: {}]   ;;  %s326_s2 = inlined_call_operand.vmem [shape: f32[1,128], index: 2, kind: input, shape index: {}]   ;;  %s327_s3 = inlined_call_operand.hbm [shape: f32[16,128], index: 3, kind: output, shape index: {}]  }
   0x1   :  { %9 = vsyncpa [#allocation6], 0 }
   0x2   :  { %10 = vsyncpa [#allocation4], 0  ;;  %s251_s12 = smov [#allocation2]   ;;  %s179_s16 = scalar_lea.hbm %s324_s0, 256 }
   0x3   :  { %s16_s13 = sshll.u32 %s251_s12, 4  ;;  %p180_p0 = scmp.ne.s32.totalorder %s324_s0, %s179_s16  ;;  %s17_s13 = int_to_ptr.vmem [resolvable:$true] %s16_s13 }
   0x4   :  { %p183_p1 = scmp.lt.u32.totalorder %s179_s16, %s324_s0 }
   0x6   :  { %p185_p2 = pnand %p183_p1, %p180_p0 }
   0x8   :  { %188 = shalt.err (!%p185_p2)
}
   0x9   :  { %s189_s21 = scalar_lea.vmem %s17_s13, 256  ;;  %p194_p4 = scmp.lt.s32.totalorder %s17_s13, %s17_s13 }
   0xa   :  { %p190_p3 = scmp.ne.s32.totalorder %s17_s13, %s189_s21  ;;  %p195_p5 = scmp.lt.s32.totalorder %s189_s21, %s189_s21 }
   0xc   :  { %p196_p6 = por %p195_p5, %p194_p4 }
   0xe   :  { %p197_p7 = pnand %p196_p6, %p190_p3 }
  0x10   :  { %200 = shalt.err (!%p197_p7)
}
  0x11   :  { %s252_s22 = smov 128   ;;  %s253_s23 = smov 8  }
  0x12   :  { %22 = dma.hbm_to_vmem [thread:$0]  %s324_s0, 256, %s17_s13, [#allocation3], %s252_s22, %s252_s22, %s253_s23  }
  0x13   :  { %s254_s26 = smov [#allocation5]   ;;  %s201_s30 = scalar_lea.hbm %s325_s1, 256 }
  0x14   :  { %s28_s27 = sshll.u32 %s254_s26, 4  ;;  %p202_p8 = scmp.ne.s32.totalorder %s325_s1, %s201_s30  ;;  %s29_s27 = int_to_ptr.vmem [resolvable:$true] %s28_s27 }
  0x15   :  { %p205_p9 = scmp.lt.u32.totalorder %s201_s30, %s325_s1 }
  0x17   :  { %p207_p10 = pnand %p205_p9, %p202_p8 }
  0x19   :  { %210 = shalt.err (!%p207_p10)
}
  0x1a   :  { %s211_s8 = scalar_lea.vmem %s29_s27, 256  ;;  %p216_p12 = scmp.lt.s32.totalorder %s29_s27, %s29_s27 }
  0x1b   :  { %p212_p11 = scmp.ne.s32.totalorder %s29_s27, %s211_s8  ;;  %p217_p13 = scmp.lt.s32.totalorder %s211_s8, %s211_s8 }
  0x1d   :  { %p218_p0 = por %p217_p13, %p216_p12 }
  0x1f   :  { %p219_p1 = pnand %p218_p0, %p212_p11 }
  0x21   :  { %222 = shalt.err (!%p219_p1)
}
  0x22   :  { %34 = dma.hbm_to_vmem [thread:$0]  %s325_s1, 256, %s29_s27, [#allocation6], %s252_s22, %s252_s22, %s253_s23  }
  0x23   :  { %245 = dma.done.wait [#allocation3], 256  }
  0x24   :  { %246 = vsyncadd [#allocation3], 4294967040 }
  0x25   :  { %247 = dma.done.wait [#allocation6], 256  }
  0x26   :  { %248 = vsyncadd [#allocation6], 4294967040  ;;  %vm54_vm0 = vcmask 130048   ;;  %v45_v0 = vld [vmem:[#allocation5] sm:$0xff]  ;;  %v46_v1 = vld [vmem:[#allocation5 + $0x8] sm:$0xff]  ;;  %s255_s12 = smov [#allocation7]  }
  0x27   :  { %v43_v2 = vld [vmem:[#allocation2] sm:$0xff]  ;;  %v170_v3 = vpack.c.bf16 %v46_v1, %v45_v0  ;;  %v44_v4 = vld [vmem:[#allocation2 + $0x8] sm:$0xff]  ;;  %s143_s1 = sshll.u32 %s255_s12, 4  ;;  %s144_s1 = int_to_ptr.vmem [resolvable:$true] %s143_s1 }
  0x28   :  { %167 = vmatprep.mubr.msk.f32.mxu0 %vm54_vm0, %v43_v2  ;;  %v156_v5 = vld [vmem:[%s326_s2] ss:$0 sm:$0xff]  ;;  %s223_s13 = scalar_lea.vmem %s144_s1, 256  ;;  %p228_p3 = scmp.lt.s32.totalorder %s144_s1, %s144_s1 }
  0x29   :  { %171 = vmatprep.subr.bf16.mxu0 %v170_v3  ;;  %p224_p2 = scmp.ne.s32.totalorder %s144_s1, %s223_s13  ;;  %p229_p4 = scmp.lt.s32.totalorder %s223_s13, %s223_s13 }
  0x2a   :  { %173 = vmatpush3.bf16.msra.mxu0 %v170_v3 }
  0x2b   :  { %p230_p5 = por %p229_p4, %p228_p3 }
  0x2d   :  { %168 = vmatmul.mubr.msk.f32.vlgmr.msra.gmra.mrb[0].mxu0 %vm54_vm0, %v44_v4  ;;  %p231_p6 = pnand %p230_p5, %p224_p2 }
 0x100   :  { %v169_v6 = vpop.f32.mrb[0].mxu0 }
 0x101   :  { %v133_v7 = vadd.f32 %v169_v6, %v156_v5  ;;  %v127_v8 = vpop.f32.mrb[1].mxu0 }
 0x102   :  { %v128_v9 = vadd.f32 %v156_v5, %v127_v8 }
 0x103   :  { %137 = vst [vmem:[#allocation7 + $0x8] sm:$0xff] %v133_v7 }
 0x104   :  { %136 = vst [vmem:[#allocation7] sm:$0xff] %v128_v9 }
 0x105   :  { %234 = shalt.err (!%p231_p6)
}
 0x106   :  { %s235_s2 = scalar_lea.hbm %s327_s3, 256 }
 0x107   :  { %p236_p7 = scmp.ne.s32.totalorder %s327_s3, %s235_s2  ;;  %p239_p8 = scmp.lt.u32.totalorder %s235_s2, %s327_s3 }
 0x109   :  { %p241_p9 = pnand %p239_p8, %p236_p7 }
 0x10b   :  { %244 = shalt.err (!%p241_p9)
}
 0x10c   :  { %149 = dma.vmem_to_hbm [thread:$0]  %s144_s1, 256, %s327_s3, [#allocation4], %s252_s22, %s252_s22, %s253_s23  }
 0x10d   :  { %249 = dma.done.wait [#allocation4], 256  }
 0x10e   :  { %250 = vsyncadd [#allocation4], 4294967040 }
 0x10f   :  { %153 = vsyncpa [#allocation3], 1 }
 0x110   :  { %154 = vsyncpa [#allocation6], 1 }
 0x111   :  { %155 = vsyncpa [#allocation4], 1 }

</bundles_post_ra>
